<compile_context>
chip_gen: v7x
topology: tpu7x:2x2x1
jax: 0.10.0
libtpu: 0.0.40
codegen_flags: <defaults>
</compile_context>

<pallas_src>
import jax
import jax.numpy as jnp
from jax.experimental import pallas as pl
from jax.experimental.pallas import tpu as pltpu

LANE = 128  # lane width; every packed channel dim is padded to this


def _round_up(x, m):
    return -(-x // m) * m


def _choose_tiling(m3, target=512):
    """Stage-3 rows (super-patches) per grid step and number of grid steps.

    Guarantees:
      * T3 is a multiple of 8 and <= target (bounded block -> fits scoped VMEM
        on all generations, including v7x's 64 MiB).
      * G >= 2 whenever the padded problem has more than one 8-row group, so
        the "parallel" grid axis actually feeds both v7x TensorCores.
      * M3 is padded up to G*T3 host-side (padded rows are sliced off).
    """
    m3_8 = _round_up(max(m3, 1), 8)
    if m3_8 <= 8:
        return 8, 1
    t3 = min(target, _round_up(m3_8 // 2, 8))      # at least two tiles
    g = -(-m3_8 // t3)
    t3 = _round_up(-(-m3_8 // g), 8)               # rebalance: minimize padding
    return t3, g


def _block_diag(block, n, rows, cols):
    """Place `n` copies of `block` on the diagonal of a zero (rows, cols)."""
    rb, cb = block.shape
    out = jnp.zeros((rows, cols), jnp.float32)
    for q in range(n):
        out = out.at[q * rb:(q + 1) * rb, q * cb:(q + 1) * cb].set(block)
    return out


# ----------------------------------------------------------------------------
# Fused 3-stage pyramid kernel.
#
# One kernel row = one stage-3 output pixel (n, h3, w3), i.e. one 8x8 input
# super-patch.  Lane layouts (all zero-padded to 128 lanes):
#   x  row : ((p2*4 + p1)*4 + p0)*Cin + c   (256 features, p* = 2x2 positions)
#   y1 row : (p2*4 + p1)*C1 + c             (16 stage-1 pixels -> 128 lanes)
#   y2 row : p2*C2 + c                      ( 4 stage-2 pixels ->  64 lanes)
#   y3 row : c                              (                      32 lanes)
# Block-diagonal weights make every stage a single dense MXU matmul.
# ----------------------------------------------------------------------------
def _fused_pyramid_kernel(x_ref, w1_ref, w2_ref, w3_ref, b_ref,
                          y1_ref, y2_ref, y3_ref):
    b = b_ref[...]                                              # (3, LANE) f32

    # stage 1: (T3, 256) x (256, 128); f32 accumulate, bias+ReLU in f32,
    # cast once to bf16 (store dtype) and reuse the bf16 value for stage 2.
    h1 = jnp.dot(x_ref[...], w1_ref[...], preferred_element_type=jnp.float32)
    h1 = jnp.maximum(h1 + b[0:1, :], 0.0).astype(y1_ref.dtype)
    y1_ref[...] = h1

    # stage 2: single (T3, 128) x (128, 128) matmul (block-diagonal weight).
    h2 = jnp.dot(h1, w2_ref[...], preferred_element_type=jnp.float32)
    h2 = jnp.maximum(h2 + b[1:2, :], 0.0).astype(y2_ref.dtype)
    y2_ref[...] = h2

    # stage 3: single (T3, 128) x (128, 128) matmul.
    h3 = jnp.dot(h2, w3_ref[...], preferred_element_type=jnp.float32)
    h3 = jnp.maximum(h3 + b[2:3, :], 0.0).astype(y3_ref.dtype)
    y3_ref[...] = h3


def init_backbone_params(key, in_ch=4, widths=(8, 16, 32)):
    """Deterministic synthetic backbone parameters (three patchify stages)."""
    params = []
    cin = in_ch
    for cout in widths:
        key, kw, kb = jax.random.split(key, 3)
        w = jax.random.normal(kw, (2, 2, cin, cout), dtype=jnp.float32) * 0.1
        b = jax.random.normal(kb, (cout,), dtype=jnp.float32) * 0.01
        params.append((w, b))
        cin = cout
    return params


def backbone_wrapper_forward(x_nchw, params, *, t3_target=512):
    """Equivalent of BackboneWrapper.forward for a FeatureListNet-style
    backbone: returns a list of intermediate feature maps (NCHW, float32)."""
    (w1, b1), (w2, b2), (w3, b3) = params
    N, Cin, H, W = x_nchw.shape
    assert H % 8 == 0 and W % 8 == 0, "3 stride-2 stages need H,W % 8 == 0"
    C1, C2, C3 = w1.shape[-1], w2.shape[-1], w3.shape[-1]
    assert 16 * C1 <= LANE and 4 * C2 <= LANE and C3 <= LANE

    H3, W3 = H // 8, W // 8
    M3 = N * H3 * W3
    T3, G = _choose_tiling(M3, target=t3_target)
    M3p = G * T3

    K0 = 4 * Cin            # stage-1 im2col features per stage-1 pixel
    KX = 16 * K0            # packed input features per super-patch row
    KXp = _round_up(KX, LANE)

    # ---- host-side one-time layout: NCHW -> super-patch row-major, bf16 ----
    # h = 8*h3 + 4*a2 + 2*a1 + a0,  w = 8*w3 + 4*b2 + 2*b1 + b0
    x = jnp.transpose(x_nchw, (0, 2, 3, 1)).astype(jnp.float32)       # NHWC
    x = x.reshape(N, H3, 2, 2, 2, W3, 2, 2, 2, Cin)   # n h3 a2 a1 a0 w3 b2 b1 b0 c
    x = x.transpose(0, 1, 5, 2, 6, 3, 7, 4, 8, 9)     # n h3 w3 a2 b2 a1 b1 a0 b0 c
    x = x.reshape(M3, KX)
    x1 = jnp.zeros((M3p, KXp), jnp.bfloat16).at[:M3, :KX].set(
        x.astype(jnp.bfloat16))

    # ---- block-diagonal, lane-packed bf16 weights; f32 biases --------------
    w1p = _block_diag(w1.reshape(K0, C1), 16, KXp, LANE).astype(jnp.bfloat16)
    w2p = _block_diag(w2.reshape(4 * C1, C2), 4, LANE, LANE).astype(jnp.bfloat16)
    w3p = jnp.zeros((LANE, LANE), jnp.float32).at[:4 * C2, :C3].set(
        w3.reshape(4 * C2, C3)).astype(jnp.bfloat16)
    bp = jnp.zeros((3, LANE), jnp.float32)
    bp = bp.at[0, :16 * C1].set(jnp.tile(b1, 16))
    bp = bp.at[1, :4 * C2].set(jnp.tile(b2, 4))
    bp = bp.at[2, :C3].set(b3)

    y1p, y2p, y3p = pl.pallas_call(
        _fused_pyramid_kernel,
        out_shape=(
            jax.ShapeDtypeStruct((M3p, LANE), jnp.bfloat16),
            jax.ShapeDtypeStruct((M3p, LANE), jnp.bfloat16),
            jax.ShapeDtypeStruct((M3p, LANE), jnp.bfloat16),
        ),
        grid=(G,),
        in_specs=[
            pl.BlockSpec((T3, KXp), lambda g: (g, 0)),
            pl.BlockSpec((KXp, LANE), lambda g: (0, 0)),
            pl.BlockSpec((LANE, LANE), lambda g: (0, 0)),
            pl.BlockSpec((LANE, LANE), lambda g: (0, 0)),
            pl.BlockSpec((3, LANE), lambda g: (0, 0)),
        ],
        out_specs=(
            pl.BlockSpec((T3, LANE), lambda g: (g, 0)),
            pl.BlockSpec((T3, LANE), lambda g: (g, 0)),
            pl.BlockSpec((T3, LANE), lambda g: (g, 0)),
        ),
        compiler_params=pltpu.CompilerParams(
            dimension_semantics=("parallel",)),
    )(x1, w1p, w2p, w3p, bp)

    # ---- un-pack outputs back to spatial NCHW maps (host interface) --------
    # stage 3: lanes [0, C3) are the channels of pixel (h3, w3)
    f3 = y3p[:M3, :C3].astype(jnp.float32).reshape(N, H3, W3, C3)
    # stage 2: lanes = (a2, b2, c); pixel (2*h3 + a2, 2*w3 + b2)
    f2 = y2p[:M3, :4 * C2].astype(jnp.float32).reshape(N, H3, W3, 2, 2, C2)
    f2 = f2.transpose(0, 1, 3, 2, 4, 5).reshape(N, 2 * H3, 2 * W3, C2)
    # stage 1: lanes = (a2, b2, a1, b1, c); pixel (4*h3+2*a2+a1, 4*w3+2*b2+b1)
    f1 = y1p[:M3, :16 * C1].astype(jnp.float32).reshape(
        N, H3, W3, 2, 2, 2, 2, C1)                        # n h3 w3 a2 b2 a1 b1 c
    f1 = f1.transpose(0, 1, 3, 5, 2, 4, 6, 7)             # n h3 a2 a1 w3 b2 b1 c
    f1 = f1.reshape(N, 4 * H3, 4 * W3, C1)

    # External (PyTorch) NCHW interface.
    return [jnp.transpose(f, (0, 3, 1, 2)) for f in (f1, f2, f3)]


def _reference_forward(x_nchw, params):
    """Plain-JAX f32 reference (standard per-stage im2col conv)."""
    x = jnp.transpose(x_nchw, (0, 2, 3, 1))
    feats = []
    for (w, b) in params:
        N, H, W, Cin = x.shape
        Cout = w.shape[-1]
        Ho, Wo = H // 2, W // 2
        p = x.reshape(N, Ho, 2, Wo, 2, Cin).transpose(0, 1, 3, 2, 4, 5)
        p = p.reshape(N * Ho * Wo, 4 * Cin)
        y = jnp.maximum(p @ w.reshape(4 * Cin, Cout) + b, 0.0)
        x = y.reshape(N, Ho, Wo, Cout)
        feats.append(jnp.transpose(x, (0, 3, 1, 2)))
    return feats


def _check(feats, refs):
    for f, r in zip(feats, refs):
        assert f.shape == r.shape, (f.shape, r.shape)
        rel = float(jnp.linalg.norm(f - r) / (jnp.linalg.norm(r) + 1e-6))
        mad = float(jnp.max(jnp.abs(f - r)))
        # bf16 activations/weights end-to-end (f32 accumulate): loose tolerance
        assert rel < 2e-2 and mad < 1e-1, (rel, mad)


if __name__ == "__main__":
    key = jax.random.PRNGKey(0)
    key, kx = jax.random.split(key)

    # Small NCHW input, PyTorch convention: batch=2, channels=4, spatial=16x16
    x = jax.random.normal(kx, (2, 4, 16, 16), dtype=jnp.float32)
    params = init_backbone_params(key, in_ch=4, widths=(8, 16, 32))

    feats = backbone_wrapper_forward(x, params)
    feats = [jax.block_until_ready(f) for f in feats]
    _check(feats, _reference_forward(x, params))
    assert [tuple(f.shape) for f in feats] == [(2, 8, 8, 8), (2, 16, 4, 4), (2, 32, 2, 2)]

    # Second shape exercises the row-padding + multi-tile (G >= 2) path.
    key, kx2 = jax.random.split(key)
    x2 = jax.random.normal(kx2, (1, 4, 40, 24), dtype=jnp.float32)
    feats2 = [jax.block_until_ready(f) for f in backbone_wrapper_forward(x2, params)]
    _check(feats2, _reference_forward(x2, params))
    assert [tuple(f.shape) for f in feats2] == [(1, 8, 20, 12), (1, 16, 10, 6), (1, 32, 5, 3)]

    print("KERNEL_OK")
</pallas_src>

<mosaic_0001>
module attributes {stable_mosaic.version = 11 : i64} {
  func.func @_fused_pyramid_kernel(%arg0: i32, %arg1: memref<8x256xbf16, #tpu.memory_space<vmem>>, %arg2: memref<256x128xbf16, #tpu.memory_space<vmem>>, %arg3: memref<128x128xbf16, #tpu.memory_space<vmem>>, %arg4: memref<128x128xbf16, #tpu.memory_space<vmem>>, %arg5: memref<3x128xf32, #tpu.memory_space<vmem>>, %arg6: memref<8x128xbf16, #tpu.memory_space<vmem>>, %arg7: memref<8x128xbf16, #tpu.memory_space<vmem>>, %arg8: memref<8x128xbf16, #tpu.memory_space<vmem>>) attributes {dimension_semantics = [#tpu.dimension_semantics<parallel>], iteration_bounds = array<i64: 1>, scalar_prefetch = 0 : i64, scratch_operands = 0 : i64, tpu.core_type = #tpu.core_type<tc>, window_params = [{transform_indices = @transform_0, window_bounds = array<i64: 8, 256>}, {pipeline_mode = #tpu.pipeline_mode<synchronous>, transform_indices = @transform_1, window_bounds = array<i64: 256, 128>}, {pipeline_mode = #tpu.pipeline_mode<synchronous>, transform_indices = @transform_2, window_bounds = array<i64: 128, 128>}, {pipeline_mode = #tpu.pipeline_mode<synchronous>, transform_indices = @transform_3, window_bounds = array<i64: 128, 128>}, {pipeline_mode = #tpu.pipeline_mode<synchronous>, transform_indices = @transform_4, window_bounds = array<i64: 3, 128>}, {transform_indices = @transform_5, window_bounds = array<i64: 8, 128>}, {transform_indices = @transform_6, window_bounds = array<i64: 8, 128>}, {transform_indices = @transform_7, window_bounds = array<i64: 8, 128>}]} {
    %c0 = arith.constant 0 : index
    %c0_0 = arith.constant 0 : index
    %0 = vector.load %arg5[%c0, %c0_0] : memref<3x128xf32, #tpu.memory_space<vmem>>, vector<3x128xf32>
    %c0_1 = arith.constant 0 : index
    %c0_2 = arith.constant 0 : index
    %1 = vector.load %arg1[%c0_1, %c0_2] : memref<8x256xbf16, #tpu.memory_space<vmem>>, vector<8x256xbf16>
    %c0_3 = arith.constant 0 : index
    %c0_4 = arith.constant 0 : index
    %2 = vector.load %arg2[%c0_3, %c0_4] : memref<256x128xbf16, #tpu.memory_space<vmem>>, vector<256x128xbf16>
    %cst = arith.constant dense<0.000000e+00> : vector<8x128xf32>
    %3 = tpu.matmul %1, %2, %cst {dimension_numbers = #tpu.dot_dimension_numbers<[1], [0], [0], [1], [0, 0, 1, 1], [], []>} : vector<8x256xbf16>, vector<256x128xbf16>, vector<8x128xf32> -> vector<8x128xf32>
    %4 = vector.extract_strided_slice %0 {offsets = [0, 0], sizes = [1, 128], strides = [1, 1]} : vector<3x128xf32> to vector<1x128xf32>
    %5 = vector.broadcast %4 : vector<1x128xf32> to vector<8x128xf32>
    %6 = arith.addf %3, %5 : vector<8x128xf32>
    %cst_5 = arith.constant 0.000000e+00 : f32
    %7 = vector.broadcast %cst_5 : f32 to vector<8x128xf32>
    %8 = arith.maximumf %6, %7 : vector<8x128xf32>
    %9 = arith.truncf %8 : vector<8x128xf32> to vector<8x128xbf16>
    %c0_6 = arith.constant 0 : index
    %c0_7 = arith.constant 0 : index
    %10 = vector.load %arg6[%c0_6, %c0_7] : memref<8x128xbf16, #tpu.memory_space<vmem>>, vector<8x128xbf16>
    tpu.vector_store %arg6[%c0_6, %c0_7], %9 {strides = array<i32>} : memref<8x128xbf16, #tpu.memory_space<vmem>>, vector<8x128xbf16>,
    %c0_8 = arith.constant 0 : index
    %c0_9 = arith.constant 0 : index
    %11 = vector.load %arg3[%c0_8, %c0_9] : memref<128x128xbf16, #tpu.memory_space<vmem>>, vector<128x128xbf16>
    %cst_10 = arith.constant dense<0.000000e+00> : vector<8x128xf32>
    %12 = tpu.matmul %9, %11, %cst_10 {dimension_numbers = #tpu.dot_dimension_numbers<[1], [0], [0], [1], [0, 0, 1, 1], [], []>} : vector<8x128xbf16>, vector<128x128xbf16>, vector<8x128xf32> -> vector<8x128xf32>
    %13 = vector.extract_strided_slice %0 {offsets = [1, 0], sizes = [1, 128], strides = [1, 1]} : vector<3x128xf32> to vector<1x128xf32>
    %14 = vector.broadcast %13 : vector<1x128xf32> to vector<8x128xf32>
    %15 = arith.addf %12, %14 : vector<8x128xf32>
    %cst_11 = arith.constant 0.000000e+00 : f32
    %16 = vector.broadcast %cst_11 : f32 to vector<8x128xf32>
    %17 = arith.maximumf %15, %16 : vector<8x128xf32>
    %18 = arith.truncf %17 : vector<8x128xf32> to vector<8x128xbf16>
    %c0_12 = arith.constant 0 : index
    %c0_13 = arith.constant 0 : index
    %19 = vector.load %arg7[%c0_12, %c0_13] : memref<8x128xbf16, #tpu.memory_space<vmem>>, vector<8x128xbf16>
    tpu.vector_store %arg7[%c0_12, %c0_13], %18 {strides = array<i32>} : memref<8x128xbf16, #tpu.memory_space<vmem>>, vector<8x128xbf16>,
    %c0_14 = arith.constant 0 : index
    %c0_15 = arith.constant 0 : index
    %20 = vector.load %arg4[%c0_14, %c0_15] : memref<128x128xbf16, #tpu.memory_space<vmem>>, vector<128x128xbf16>
    %cst_16 = arith.constant dense<0.000000e+00> : vector<8x128xf32>
    %21 = tpu.matmul %18, %20, %cst_16 {dimension_numbers = #tpu.dot_dimension_numbers<[1], [0], [0], [1], [0, 0, 1, 1], [], []>} : vector<8x128xbf16>, vector<128x128xbf16>, vector<8x128xf32> -> vector<8x128xf32>
    %22 = vector.extract_strided_slice %0 {offsets = [2, 0], sizes = [1, 128], strides = [1, 1]} : vector<3x128xf32> to vector<1x128xf32>
    %23 = vector.broadcast %22 : vector<1x128xf32> to vector<8x128xf32>
    %24 = arith.addf %21, %23 : vector<8x128xf32>
    %cst_17 = arith.constant 0.000000e+00 : f32
    %25 = vector.broadcast %cst_17 : f32 to vector<8x128xf32>
    %26 = arith.maximumf %24, %25 : vector<8x128xf32>
    %27 = arith.truncf %26 : vector<8x128xf32> to vector<8x128xbf16>
    %c0_18 = arith.constant 0 : index
    %c0_19 = arith.constant 0 : index
    %28 = vector.load %arg8[%c0_18, %c0_19] : memref<8x128xbf16, #tpu.memory_space<vmem>>, vector<8x128xbf16>
    tpu.vector_store %arg8[%c0_18, %c0_19], %27 {strides = array<i32>} : memref<8x128xbf16, #tpu.memory_space<vmem>>, vector<8x128xbf16>,
    return
  }
  func.func @transform_0(%arg0: i32) -> (i32, i32) {
    %c0_i32 = arith.constant 0 : i32
    %c0_i32_0 = arith.constant 0 : i32
    return %arg0, %c0_i32 : i32, i32
  }
  func.func @transform_1(%arg0: i32) -> (i32, i32) {
    %c0_i32 = arith.constant 0 : i32
    %c0_i32_0 = arith.constant 0 : i32
    %c0_i32_1 = arith.constant 0 : i32
    return %c0_i32, %c0_i32_0 : i32, i32
  }
  func.func @transform_2(%arg0: i32) -> (i32, i32) {
    %c0_i32 = arith.constant 0 : i32
    %c0_i32_0 = arith.constant 0 : i32
    %c0_i32_1 = arith.constant 0 : i32
    return %c0_i32, %c0_i32_0 : i32, i32
  }
  func.func @transform_3(%arg0: i32) -> (i32, i32) {
    %c0_i32 = arith.constant 0 : i32
    %c0_i32_0 = arith.constant 0 : i32
    %c0_i32_1 = arith.constant 0 : i32
    return %c0_i32, %c0_i32_0 : i32, i32
  }
  func.func @transform_4(%arg0: i32) -> (i32, i32) {
    %c0_i32 = arith.constant 0 : i32
    %c0_i32_0 = arith.constant 0 : i32
    %c0_i32_1 = arith.constant 0 : i32
    return %c0_i32, %c0_i32_0 : i32, i32
  }
  func.func @transform_5(%arg0: i32) -> (i32, i32) {
    %c0_i32 = arith.constant 0 : i32
    %c0_i32_0 = arith.constant 0 : i32
    return %arg0, %c0_i32 : i32, i32
  }
  func.func @transform_6(%arg0: i32) -> (i32, i32) {
    %c0_i32 = arith.constant 0 : i32
    %c0_i32_0 = arith.constant 0 : i32
    return %arg0, %c0_i32 : i32, i32
  }
  func.func @transform_7(%arg0: i32) -> (i32, i32) {
    %c0_i32 = arith.constant 0 : i32
    %c0_i32_0 = arith.constant 0 : i32
    return %arg0, %c0_i32 : i32, i32
  }
}

</mosaic_0001>

<bundles_post_ra>
// kernel: tpu_custom_call.1
= control target key start
LH: loop header
LB: loop body
LE: loop exit
PB: predicated region body
PF: predicated region fallthrough
CT: control target
= control target key end

     0   :  { %13 = vsyncpa [#allocation3], 0  ;;  %s1022_s0 = inlined_call_operand.hbm [shape: bf16[8,256], index: 0, kind: input, shape index: {}]   ;;  %s1023_s1 = inlined_call_operand.hbm [shape: bf16[256,128], index: 1, kind: input, shape index: {}]   ;;  %s1024_s2 = inlined_call_operand.hbm [shape: bf16[128,128], index: 2, kind: input, shape index: {}]   ;;  %s1025_s3 = inlined_call_operand.hbm [shape: bf16[128,128], index: 3, kind: input, shape index: {}]   ;;  %s1026_s4 = inlined_call_operand.vmem [shape: f32[3,128], index: 4, kind: input, shape index: {}]   ;;  %s1027_s5 = inlined_call_operand.hbm [shape: bf16[8,128], index: 5, kind: output, shape index: {0}]   ;;  %s1028_s6 = inlined_call_operand.hbm [shape: bf16[8,128], index: 6, kind: output, shape index: {1}]   ;;  %s1029_s7 = inlined_call_operand.hbm [shape: bf16[8,128], index: 7, kind: output, shape index: {2}]  }
   0x1   :  { %14 = vsyncpa [#allocation6], 0 }
   0x2   :  { %15 = vsyncpa [#allocation9], 0 }
   0x3   :  { %16 = vsyncpa [#allocation4], 0 }
   0x4   :  { %17 = vsyncpa [#allocation12], 0  ;;  %s852_s24 = smov [#allocation5]   ;;  %s688_s28 = scalar_lea.hbm %s1023_s1, 2048 }
   0x5   :  { %s33_s25 = sshll.u32 %s852_s24, 4  ;;  %p689_p0 = scmp.ne.s32.totalorder %s1023_s1, %s688_s28  ;;  %s34_s25 = int_to_ptr.vmem [resolvable:$true] %s33_s25 }
   0x6   :  { %p692_p1 = scmp.lt.u32.totalorder %s688_s28, %s1023_s1 }
   0x8   :  { %p694_p2 = pnand %p692_p1, %p689_p0 }
   0xa   :  { %697 = shalt.err (!%p694_p2)
}
   0xb   :  { %s698_s10 = scalar_lea.vmem %s34_s25, 2048  ;;  %p703_p4 = scmp.lt.s32.totalorder %s34_s25, %s34_s25 }
   0xc   :  { %p699_p3 = scmp.ne.s32.totalorder %s34_s25, %s698_s10  ;;  %p704_p5 = scmp.lt.s32.totalorder %s698_s10, %s698_s10 }
   0xe   :  { %p705_p6 = por %p704_p5, %p703_p4 }
  0x10   :  { %p706_p7 = pnand %p705_p6, %p699_p3 }
  0x12   :  { %709 = shalt.err (!%p706_p7)
}
  0x13   :  { %s853_s11 = smov 64   ;;  %s854_s12 = smov 4  }
  0x14   :  { %39 = dma.hbm_to_vmem [thread:$0]  %s1023_s1, 2048, %s34_s25, [#allocation6], %s853_s11, %s853_s11, %s854_s12  }
  0x15   :  { %s855_s15 = smov [#allocation2]   ;;  %s856_s17 = smov [#allocation7]  }
  0x16   :  { %s24_s16 = sshll.u32 %s855_s15, 4  ;;  %s45_s18 = sshll.u32 %s856_s17, 4  ;;  %s25_s16 = int_to_ptr.vmem [resolvable:$true] %s24_s16  ;;  %s46_s18 = int_to_ptr.vmem [resolvable:$true] %s45_s18 }
  0x17   :  { %s710_s21 = scalar_lea.hbm %s1022_s0, 128 }
  0x18   :  { %p711_p8 = scmp.ne.s32.totalorder %s1022_s0, %s710_s21  ;;  %p714_p9 = scmp.lt.u32.totalorder %s710_s21, %s1022_s0 }
  0x1a   :  { %p716_p10 = pnand %p714_p9, %p711_p8 }
  0x1c   :  { %719 = shalt.err (!%p716_p10)
}
  0x1d   :  { %s720_s1 = scalar_lea.vmem %s25_s16, 128  ;;  %p725_p12 = scmp.lt.s32.totalorder %s25_s16, %s25_s16 }
  0x1e   :  { %p721_p11 = scmp.ne.s32.totalorder %s25_s16, %s720_s1  ;;  %p726_p13 = scmp.lt.s32.totalorder %s720_s1, %s720_s1 }
  0x20   :  { %p727_p0 = por %p726_p13, %p725_p12 }
  0x22   :  { %p728_p1 = pnand %p727_p0, %p721_p11 }
  0x24   :  { %731 = shalt.err (!%p728_p1)
}
  0x25   :  { %27 = dma.hbm_to_vmem [thread:$0]  %s1022_s0, 128, %s25_s16, [#allocation3]  }
  0x26   :  { %s732_s30 = scalar_lea.hbm %s1024_s2, 1024 }
  0x27   :  { %p733_p2 = scmp.ne.s32.totalorder %s1024_s2, %s732_s30  ;;  %p736_p3 = scmp.lt.u32.totalorder %s732_s30, %s1024_s2 }
  0x29   :  { %p738_p4 = pnand %p736_p3, %p733_p2 }
  0x2b   :  { %741 = shalt.err (!%p738_p4)
}
  0x2c   :  { %s742_s14 = scalar_lea.vmem %s46_s18, 1024  ;;  %p747_p6 = scmp.lt.s32.totalorder %s46_s18, %s46_s18 }
  0x2d   :  { %p743_p5 = scmp.ne.s32.totalorder %s46_s18, %s742_s14  ;;  %p748_p7 = scmp.lt.s32.totalorder %s742_s14, %s742_s14 }
  0x2f   :  { %p749_p8 = por %p748_p7, %p747_p6 }
  0x31   :  { %p750_p9 = pnand %p749_p8, %p743_p5 }
  0x33   :  { %753 = shalt.err (!%p750_p9)
}
  0x34   :  { %51 = dma.hbm_to_vmem [thread:$0]  %s1024_s2, 1024, %s46_s18, [#allocation6], %s853_s11, %s853_s11, %s854_s12  }
  0x35   :  { %s857_s16 = smov [#allocation8]   ;;  %s754_s21 = scalar_lea.hbm %s1025_s3, 1024 }
  0x36   :  { %s57_s17 = sshll.u32 %s857_s16, 4  ;;  %p755_p10 = scmp.ne.s32.totalorder %s1025_s3, %s754_s21  ;;  %s58_s17 = int_to_ptr.vmem [resolvable:$true] %s57_s17 }
  0x37   :  { %p758_p11 = scmp.lt.u32.totalorder %s754_s21, %s1025_s3 }
  0x39   :  { %p760_p12 = pnand %p758_p11, %p755_p10 }
  0x3b   :  { %763 = shalt.err (!%p760_p12)
}
  0x3c   :  { %s764_s1 = scalar_lea.vmem %s58_s17, 1024  ;;  %p769_p0 = scmp.lt.s32.totalorder %s58_s17, %s58_s17 }
  0x3d   :  { %p765_p13 = scmp.ne.s32.totalorder %s58_s17, %s764_s1  ;;  %p770_p1 = scmp.lt.s32.totalorder %s764_s1, %s764_s1 }
  0x3f   :  { %p771_p2 = por %p770_p1, %p769_p0 }
  0x41   :  { %p772_p3 = pnand %p771_p2, %p765_p13 }
  0x43   :  { %775 = shalt.err (!%p772_p3)
}
  0x44   :  { %63 = dma.hbm_to_vmem [thread:$0]  %s1025_s3, 1024, %s58_s17, [#allocation9], %s853_s11, %s853_s11, %s854_s12  }
  0x45   :  { %842 = dma.done.wait [#allocation3], 128  }
  0x46   :  { %843 = vsyncadd [#allocation3], 4294967168 }
  0x47   :  { %844 = dma.done.wait [#allocation6], 3072  }
  0x48   :  { %845 = vsyncadd [#allocation6], 4294964224 }
  0x49   :  { %846 = dma.done.wait [#allocation9], 1024  }
  0x4a   :  { %847 = vsyncadd [#allocation9], 4294966272  ;;  %v858_v0 = vmov 0.0   ;;  %v654_v1 = vld [vmem:[#allocation5 + $0x40] sm:$0xff]   ;;  %v656_v3 = vld [vmem:[#allocation5 + $0x48] sm:$0xff]   ;;  %vm859_vm0 = vmmov 0   ;;  %v113_v34 = vlaneseq }
  0x4b   :  { %603 = vmatprep.subr.bf16.mxu1 %v858_v0  ;;  %v655_v2 = vld [vmem:[#allocation5] sm:$0xff]   ;;  %563 = vmatprep.subr.bf16.mxu0 %v654_v1  ;;  %v657_v4 = vld [vmem:[#allocation5 + $0x8] sm:$0xff]   ;;  %v658_v5 = vld [vmem:[#allocation5 + $0x50] sm:$0xff]   ;;  %s861_s25 = smov [#allocation10]  }
  0x4c   :  { %564 = vmatpush3.bf16.msra.mxu0 %v655_v2  ;;  %v659_v6 = vld [vmem:[#allocation5 + $0x10] sm:$0xff]   ;;  %v660_v7 = vld [vmem:[#allocation5 + $0x58] sm:$0xff]   ;;  %v662_v9 = vld [vmem:[#allocation5 + $0x60] sm:$0xff]   ;;  %619 = vmatprep.mubr.msk.bf16.mxu1 %vm859_vm0, %v858_v0  ;;  %v977_v35 = vshrl.u32 %v113_v34, 7  ;;  %s491_s27 = sshll.u32 %s861_s25, 4  ;;  %s492_s27 = int_to_ptr.vmem [resolvable:$true] %s491_s27 }
  0x4d   :  { %565 = vmatprep.subr.bf16.mxu0 %v656_v3  ;;  %v661_v8 = vld [vmem:[#allocation5 + $0x18] sm:$0xff]   ;;  %v663_v10 = vld [vmem:[#allocation5 + $0x20] sm:$0xff]   ;;  %v664_v11 = vld [vmem:[#allocation5 + $0x68] sm:$0xff]  }
  0x4e   :  { %v80_v12 = vld [vmem:[#allocation2] sm:$0xff]  ;;  %v672_v14 = vld [vmem:[#allocation7] sm:$0xff]   ;;  %v665_v15 = vld [vmem:[#allocation5 + $0x28] sm:$0xff]   ;;  %v115_v36 = vsub.s32 0, %v977_v35  ;;  %v281_v49 = vsub.s32 1, %v977_v35 }
  0x4f   :  { %v530_v13 = vcombine.high %v80_v12, %v80_v12  ;;  %v666_v16 = vld [vmem:[#allocation5 + $0x70] sm:$0xff]   ;;  %604 = vmatpush3.bf16.msra.mxu1 %v672_v14  ;;  %v673_v17 = vld [vmem:[#allocation7 + $0x8] sm:$0xff]   ;;  %v668_v19 = vld [vmem:[#allocation5 + $0x78] sm:$0xff]   ;;  %v529_v23 = vcombine.low %v80_v12, %v80_v12 }
  0x50   :  { %566 = vmatpush3.bf16.msra.mxu0 %v657_v4  ;;  %v667_v18 = vld [vmem:[#allocation5 + $0x30] sm:$0xff]   ;;  %605 = vmatprep.subr.bf16.mxu1 %v858_v0  ;;  %v669_v21 = vld [vmem:[#allocation5 + $0x38] sm:$0xff]   ;;  %v676_v24 = vld [vmem:[#allocation7 + $0x20] sm:$0xff]  }
  0x51   :  { %567 = vmatprep.subr.bf16.mxu0 %v658_v5  ;;  %252 = vmatprep.mubr.bf16.mxu0 %v530_v13  ;;  %v674_v20 = vld [vmem:[#allocation7 + $0x10] sm:$0xff]   ;;  %v675_v22 = vld [vmem:[#allocation7 + $0x18] sm:$0xff]   ;;  %v677_v25 = vld [vmem:[#allocation7 + $0x28] sm:$0xff]  }
  0x52   :  { %v678_v26 = vld [vmem:[#allocation7 + $0x30] sm:$0xff]   ;;  %v679_v27 = vld [vmem:[#allocation7 + $0x38] sm:$0xff]   ;;  %v680_v28 = vld [vmem:[#allocation8] sm:$0xff]  }
  0x53   :  { %606 = vmatpush3.bf16.msra.mxu1 %v673_v17  ;;  %v681_v29 = vld [vmem:[#allocation8 + $0x8] sm:$0xff]   ;;  %v682_v30 = vld [vmem:[#allocation8 + $0x10] sm:$0xff]   ;;  %v683_v31 = vld [vmem:[#allocation8 + $0x18] sm:$0xff]  }
  0x54   :  { %568 = vmatpush3.bf16.msra.mxu0 %v659_v6  ;;  %607 = vmatprep.subr.bf16.mxu1 %v858_v0  ;;  %v684_v32 = vld [vmem:[#allocation8 + $0x20] sm:$0xff]   ;;  %v685_v33 = vld [vmem:[#allocation8 + $0x28] sm:$0xff]   ;;  %v79_v37 = vld [vmem:[%s1026_s4] sm:$0x7]  ;;  %s860_s4 = smov [#allocation11]  }
  0x55   :  { %569 = vmatprep.subr.bf16.mxu0 %v660_v7  ;;  %v116_v39 = vrot.slane %v79_v37, %v115_v36  ;;  %v686_v47 = vld [vmem:[#allocation8 + $0x30] sm:$0xff]   ;;  %v687_v48 = vld [vmem:[#allocation8 + $0x38] sm:$0xff]   ;;  %v282_v50 = vrot.slane %v79_v37, %v281_v49  ;;  %s501_s12 = sshll.u32 %s860_s4, 4  ;;  %s502_s12 = int_to_ptr.vmem [resolvable:$true] %s501_s12 }
  0x56   :  { %s776_s28 = scalar_lea.vmem %s502_s12, 64  ;;  %p781_p5 = scmp.lt.s32.totalorder %s502_s12, %s502_s12 }
  0x57   :  { %608 = vmatpush3.bf16.msra.mxu1 %v674_v20  ;;  %p777_p4 = scmp.ne.s32.totalorder %s502_s12, %s776_s28  ;;  %p782_p6 = scmp.lt.s32.totalorder %s776_s28, %s776_s28 }
  0x58   :  { %570 = vmatpush3.bf16.msra.mxu0 %v661_v8  ;;  %609 = vmatprep.subr.bf16.mxu1 %v858_v0 }
  0x59   :  { %571 = vmatprep.subr.bf16.mxu0 %v662_v9  ;;  %p783_p7 = por %p782_p6, %p781_p5 }
  0x5b   :  { %610 = vmatpush3.bf16.msra.mxu1 %v675_v22  ;;  %p784_p8 = pnand %p783_p7, %p777_p4 }
  0x5c   :  { %572 = vmatpush3.bf16.msra.mxu0 %v663_v10  ;;  %611 = vmatprep.subr.bf16.mxu1 %v858_v0 }
  0x5d   :  { %573 = vmatprep.subr.bf16.mxu0 %v664_v11 }
  0x5f   :  { %612 = vmatpush3.bf16.msra.mxu1 %v676_v24 }
  0x60   :  { %574 = vmatpush3.bf16.msra.mxu0 %v665_v15  ;;  %613 = vmatprep.subr.bf16.mxu1 %v858_v0 }
  0x61   :  { %575 = vmatprep.subr.bf16.mxu0 %v666_v16 }
  0x63   :  { %614 = vmatpush3.bf16.msra.mxu1 %v677_v25 }
  0x64   :  { %576 = vmatpush3.bf16.msra.mxu0 %v667_v18  ;;  %615 = vmatprep.subr.bf16.mxu1 %v858_v0 }
  0x65   :  { %577 = vmatprep.subr.bf16.mxu0 %v668_v19 }
  0x67   :  { %616 = vmatpush3.bf16.msra.mxu1 %v678_v26 }
  0x68   :  { %578 = vmatpush3.bf16.msra.mxu0 %v669_v21  ;;  %617 = vmatprep.subr.bf16.mxu1 %v858_v0 }
  0x69   :  { %623 = vmatprep.subr.bf16.mxu0 %v858_v0 }
  0x6b   :  { %253 = vmatmul.mubr.bf16.vlgmr.msra.gmra.mrb[0].mxu0 %v529_v23  ;;  %618 = vmatpush3.bf16.msra.mxu1 %v679_v27 }
  0x6c   :  { %639 = vmatprep.mubr.msk.bf16.mxu0 %vm859_vm0, %v858_v0  ;;  %624 = vmatpush3.bf16.msra.mxu0 %v680_v28 }
  0x6d   :  { %625 = vmatprep.subr.bf16.mxu0 %v858_v0 }
  0x70   :  { %626 = vmatpush3.bf16.msra.mxu0 %v681_v29 }
  0x71   :  { %627 = vmatprep.subr.bf16.mxu0 %v858_v0 }
  0x74   :  { %628 = vmatpush3.bf16.msra.mxu0 %v682_v30 }
  0x75   :  { %629 = vmatprep.subr.bf16.mxu0 %v858_v0 }
  0x78   :  { %630 = vmatpush3.bf16.msra.mxu0 %v683_v31 }
  0x79   :  { %631 = vmatprep.subr.bf16.mxu0 %v858_v0 }
  0x7c   :  { %632 = vmatpush3.bf16.msra.mxu0 %v684_v32 }
  0x7d   :  { %633 = vmatprep.subr.bf16.mxu0 %v858_v0 }
  0x80   :  { %634 = vmatpush3.bf16.msra.mxu0 %v685_v33 }
  0x81   :  { %635 = vmatprep.subr.bf16.mxu0 %v858_v0 }
  0x84   :  { %636 = vmatpush3.bf16.msra.mxu0 %v686_v47 }
  0x85   :  { %637 = vmatprep.subr.bf16.mxu0 %v858_v0 }
  0x88   :  { %638 = vmatpush3.bf16.msra.mxu0 %v687_v48 }
 0x13e   :  { %v579_v38 = vpop.f32.mrb[0].mxu0 }
 0x13f   :  { %v580_v40 = vpop.f32.mrb[1].mxu0 }
 0x140   :  { %v581_v41 = vadd.f32 %v580_v40, %v579_v38  ;;  %v582_v42 = vpop.f32.mrb[2].mxu0 }
 0x141   :  { %v583_v43 = vpop.f32.mrb[3].mxu0 }
 0x142   :  { %v255_v44 = vadd.f32 %v581_v41, %v116_v39 }
 0x144   :  { %v260_v45 = vmax.f32 %v255_v44, 0.0 }
 0x146   :  { %v261_v46 = vpack.c.bf16 %v260_v45, %v260_v45 }
 0x148   :  { %262 = vst [vmem:[#allocation10] sm:$0xf] %v261_v46  ;;  %620 = vmatmul.mubr.bf16.vlgmr.msra.gmra.mrb[0].mxu1 %v261_v46 }
 0x21b   :  { %v365_v51 = vpop.f32.mrb[0].mxu1 }
 0x21c   :  { %v366_v52 = vadd.f32 %v365_v51, %v282_v50  ;;  %v621_v53 = vpop.f32.mrb[1].mxu1 }
 0x21d   :  { %v368_v54 = vpop.f32.mrb[2].mxu1 }
 0x21e   :  { %v371_v55 = vmax.f32 %v366_v52, 0.0  ;;  %v622_v56 = vpop.f32.mrb[3].mxu1 }
 0x220   :  { %v372_v57 = vpack.c.bf16 %v371_v55, %v371_v55 }
 0x222   :  { %373 = vst [vmem:[#allocation11] sm:$0xf] %v372_v57  ;;  %640 = vmatmul.mubr.bf16.vlgmr.msra.gmra.mrb[4].mxu0 %v372_v57 }
 0x223   :  { %787 = shalt.err (!%p784_p8)
}
 0x224   :  { %s788_s8 = scalar_lea.hbm %s1028_s6, 64 }
 0x225   :  { %p789_p9 = scmp.ne.s32.totalorder %s1028_s6, %s788_s8  ;;  %p792_p10 = scmp.lt.u32.totalorder %s788_s8, %s1028_s6 }
 0x227   :  { %p794_p11 = pnand %p792_p10, %p789_p9 }
 0x229   :  { %797 = shalt.err (!%p794_p11)
}
 0x22a   :  { %504 = dma.vmem_to_hbm [thread:$0]  %s502_s12, 64, %s1028_s6, [#allocation12]  }
 0x22b   :  { %s798_s16 = scalar_lea.vmem %s492_s27, 64  ;;  %p803_p13 = scmp.lt.s32.totalorder %s492_s27, %s492_s27 }
 0x22c   :  { %p799_p12 = scmp.ne.s32.totalorder %s492_s27, %s798_s16  ;;  %p804_p0 = scmp.lt.s32.totalorder %s798_s16, %s798_s16 }
 0x22e   :  { %p805_p1 = por %p804_p0, %p803_p13 }
 0x230   :  { %p806_p2 = pnand %p805_p1, %p799_p12 }
 0x232   :  { %809 = shalt.err (!%p806_p2)
}
 0x233   :  { %s810_s20 = scalar_lea.hbm %s1027_s5, 64 }
 0x234   :  { %p811_p3 = scmp.ne.s32.totalorder %s1027_s5, %s810_s20  ;;  %p814_p4 = scmp.lt.u32.totalorder %s810_s20, %s1027_s5 }
 0x236   :  { %p816_p5 = pnand %p814_p4, %p811_p3 }
 0x238   :  { %819 = shalt.err (!%p816_p5)
}
 0x239   :  { %494 = dma.vmem_to_hbm [thread:$0]  %s492_s27, 64, %s1027_s5, [#allocation4]   ;;  %v392_v58 = vsub.s32 2, %v977_v35 }
 0x23a   :  { %s862_s1 = smov [#allocation13]  }
 0x23b   :  { %v393_v59 = vrot.slane %v79_v37, %v392_v58  ;;  %s511_s2 = sshll.u32 %s862_s1, 4  ;;  %s512_s2 = int_to_ptr.vmem [resolvable:$true] %s511_s2 }
 0x23c   :  { %s820_s18 = scalar_lea.vmem %s512_s2, 64  ;;  %p825_p7 = scmp.lt.s32.totalorder %s512_s2, %s512_s2 }
 0x23d   :  { %p821_p6 = scmp.ne.s32.totalorder %s512_s2, %s820_s18  ;;  %p826_p8 = scmp.lt.s32.totalorder %s820_s18, %s820_s18 }
 0x23f   :  { %p827_p9 = por %p826_p8, %p825_p7 }
 0x241   :  { %p828_p10 = pnand %p827_p9, %p821_p6 }
 0x2f5   :  { %v476_v60 = vpop.f32.mrb[4].mxu0 }
 0x2f6   :  { %v477_v61 = vadd.f32 %v476_v60, %v393_v59  ;;  %v641_v62 = vpop.f32.mrb[5].mxu0 }
 0x2f7   :  { %v479_v63 = vpop.f32.mrb[6].mxu0 }
 0x2f8   :  { %v482_v0 = vmax.f32 %v477_v61, 0.0  ;;  %v642_v1 = vpop.f32.mrb[7].mxu0 }
 0x2fa   :  { %v483_v2 = vpack.c.bf16 %v482_v0, %v482_v0 }
 0x2fc   :  { %484 = vst [vmem:[#allocation13] sm:$0xf] %v483_v2 }
 0x2fd   :  { %831 = shalt.err (!%p828_p10)
}
 0x2fe   :  { %s832_s11 = scalar_lea.hbm %s1029_s7, 64 }
 0x2ff   :  { %p833_p11 = scmp.ne.s32.totalorder %s1029_s7, %s832_s11  ;;  %p836_p12 = scmp.lt.u32.totalorder %s832_s11, %s1029_s7 }
 0x301   :  { %p838_p13 = pnand %p836_p12, %p833_p11 }
 0x303   :  { %841 = shalt.err (!%p838_p13)
}
 0x304   :  { %514 = dma.vmem_to_hbm [thread:$0]  %s512_s2, 64, %s1029_s7, [#allocation12]  }
 0x305   :  { %848 = dma.done.wait [#allocation4], 64  }
 0x306   :  { %849 = vsyncadd [#allocation4], 4294967232 }
 0x307   :  { %850 = dma.done.wait [#allocation12], 128  }
 0x308   :  { %851 = vsyncadd [#allocation12], 4294967168 }
 0x309   :  { %524 = vsyncpa [#allocation3], 1 }
 0x30a   :  { %525 = vsyncpa [#allocation6], 1 }
 0x30b   :  { %526 = vsyncpa [#allocation9], 1 }
 0x30c   :  { %527 = vsyncpa [#allocation4], 1 }
 0x30d   :  { %528 = vsyncpa [#allocation12], 1 }

</bundles_post_ra>
